<compile_context>
chip_gen: v7x
topology: tpu7x:2x2x1
jax: 0.10.0
libtpu: 0.0.40
codegen_flags: <defaults>
</compile_context>

<pallas_src>
import jax
import jax.numpy as jnp
from jax.experimental import pallas as pl
from jax.experimental.pallas import tpu as pltpu


# --------------------------------------------------------------------------
# Kernel body: fused matmul + bias + activation on one (tile_p, Kp) row tile.
# --------------------------------------------------------------------------
def _fbm_kernel(x_ref, w_ref, b_ref, o_ref):
    # (tile_p, Kp) @ (Kp, Np) on the MXU with f32 accumulation.
    acc = jnp.dot(x_ref[...], w_ref[...], preferred_element_type=jnp.float32)
    acc = acc + b_ref[...]                       # bias broadcast over rows
    # (tanh(z) + 1) / 2  ==  sigmoid(2 z): single EUP transcendental.
    o_ref[...] = jax.nn.sigmoid(2.0 * acc).astype(o_ref.dtype)


# --------------------------------------------------------------------------
# Parameter packing (do this ONCE at init in a real model).
# --------------------------------------------------------------------------
def _choose_pack(input_size, num_classes):
    """How many logical rows to pack per physical row so lanes are dense."""
    pack = 1
    while 2 * pack * num_classes <= 128 and 2 * pack * input_size <= 512:
        pack *= 2
    return pack


def pack_fbm_params(weight, bias, pack):
    """weight: (N, K) (PyTorch convention), bias: (N,).

    Returns (w_packed, b_packed) of shapes (pack*K, pack*N) and (1, pack*N):
    block-diagonal replication of W.T so one packed input row computes `pack`
    logical output rows in a single lane-dense matmul.
    """
    num_classes, input_size = weight.shape
    w_t = weight.T                                           # (K, N)
    if pack == 1:
        return w_t, bias.reshape(1, num_classes)
    eye = jnp.eye(pack, dtype=w_t.dtype)
    w_packed = jnp.einsum("pq,kn->pkqn", eye, w_t).reshape(
        pack * input_size, pack * num_classes)
    b_packed = jnp.tile(bias, pack).reshape(1, pack * num_classes)
    return w_packed, b_packed


# --------------------------------------------------------------------------
# Forward pass on pre-packed parameters.
# --------------------------------------------------------------------------
def fbm_forward_packed(x, w_packed, b_packed, *, input_size, num_classes,
                       pack, tile_rows=1024, compute_dtype=None):
    out_dtype = x.dtype
    x2 = x.reshape(-1, input_size)               # x.view(-1, input_size)
    M = x2.shape[0]

    Kp = pack * input_size
    Np = pack * num_classes

    # Pad the row count so it reshapes cleanly into packed rows that are a
    # multiple of 8 (sublane).  Zero rows are harmless and sliced off below.
    row_quantum = pack * 8
    M_pad = ((M + row_quantum - 1) // row_quantum) * row_quantum
    if M_pad != M:
        x2 = jnp.pad(x2, ((0, M_pad - M), (0, 0)))
    Mp = M_pad // pack
    xp = x2.reshape(Mp, Kp)                      # bit-identical row-major reshape

    # Optional bf16 inputs (v6e / v7x): halves HBM bytes of the dominant
    # stream; accumulation and epilogue stay in f32.
    if compute_dtype is not None:
        xp = xp.astype(compute_dtype)
        w_packed = w_packed.astype(compute_dtype)

    # Tile choice: big enough (~1 MiB DMAs) to sit near the HBM roofline,
    # small enough to double-buffer comfortably even in v7x's 64 MiB VMEM.
    # Ensure >= 2 grid steps when possible so v7x megacore can shard the
    # "parallel" axis.
    tile_p = min(tile_rows, Mp)
    if Mp > 8 and pl.cdiv(Mp, tile_p) == 1:
        tile_p = ((Mp // 2 + 7) // 8) * 8
    grid = (pl.cdiv(Mp, tile_p),)                # ragged last block is fine

    out_p = pl.pallas_call(
        _fbm_kernel,
        out_shape=jax.ShapeDtypeStruct((Mp, Np), out_dtype),
        grid_spec=pltpu.PrefetchScalarGridSpec(
            num_scalar_prefetch=0,
            grid=grid,
            in_specs=[
                pl.BlockSpec((tile_p, Kp), lambda i: (i, 0)),   # x rows
                pl.BlockSpec((Kp, Np), lambda i: (0, 0)),       # packed weight
                pl.BlockSpec((1, Np), lambda i: (0, 0)),        # packed bias
            ],
            out_specs=pl.BlockSpec((tile_p, Np), lambda i: (i, 0)),
        ),
        compiler_params=pltpu.CompilerParams(
            dimension_semantics=("parallel",),
        ),
    )(xp, w_packed, b_packed)

    out = out_p.reshape(M_pad, num_classes)      # bit-identical unpack
    if M_pad != M:
        out = out[:M]
    return out


# --------------------------------------------------------------------------
# Convenience wrapper matching FBMLayer.forward(x) with PyTorch-layout params.
# (In a real model, call _choose_pack / pack_fbm_params once at init.)
# --------------------------------------------------------------------------
def fbm_layer(x, weight, bias, *, tile_rows=1024, compute_dtype=None):
    num_classes, input_size = weight.shape
    pack = _choose_pack(input_size, num_classes)
    w_packed, b_packed = pack_fbm_params(weight, bias, pack)
    return fbm_forward_packed(
        x, w_packed, b_packed,
        input_size=input_size, num_classes=num_classes, pack=pack,
        tile_rows=tile_rows, compute_dtype=compute_dtype)


def fbm_reference(x, weight, bias):
    x2 = x.reshape(-1, weight.shape[1])
    out = x2 @ weight.T + bias
    return (jnp.tanh(out) + 1.0) / 2.0


if __name__ == "__main__":
    key = jax.random.PRNGKey(0)
    k_x1, k_x2, k_w, k_b = jax.random.split(key, 4)

    # Module config: FBMLayer(input_size=32, num_classes=16)
    input_size = 32
    num_classes = 16

    weight = jax.random.normal(k_w, (num_classes, input_size), jnp.float32) * 0.1
    bias = jax.random.normal(k_b, (num_classes,), jnp.float32) * 0.1

    # Case 1: leading dims flattened by view(-1, K); M=20 exercises the
    #         pad-to-packing-quantum + slice-back path.
    x1 = jax.random.normal(k_x1, (4, 5, input_size), dtype=jnp.float32)
    out1 = jax.block_until_ready(fbm_layer(x1, weight, bias))
    ref1 = fbm_reference(x1, weight, bias)
    assert out1.shape == (20, num_classes)
    assert jnp.allclose(out1, ref1, atol=1e-5, rtol=1e-5), "case 1 mismatch"

    # Case 2: M=128 exercises the multi-step parallel grid (2 blocks).
    x2 = jax.random.normal(k_x2, (16, 8, input_size), dtype=jnp.float32)
    out2 = jax.block_until_ready(fbm_layer(x2, weight, bias))
    ref2 = fbm_reference(x2, weight, bias)
    assert out2.shape == (128, num_classes)
    assert jnp.allclose(out2, ref2, atol=1e-5, rtol=1e-5), "case 2 mismatch"

    print("KERNEL_OK")
</pallas_src>

<mosaic_0001>
module attributes {stable_mosaic.version = 11 : i64} {
  func.func @_fbm_kernel(%arg0: i32, %arg1: memref<8x256xf32, #tpu.memory_space<vmem>>, %arg2: memref<256x128xf32, #tpu.memory_space<vmem>>, %arg3: memref<1x128xf32, #tpu.memory_space<vmem>>, %arg4: memref<8x128xf32, #tpu.memory_space<vmem>>) attributes {dimension_semantics = [#tpu.dimension_semantics<parallel>], iteration_bounds = array<i64: 1>, scalar_prefetch = 0 : i64, scratch_operands = 0 : i64, tpu.core_type = #tpu.core_type<tc>, window_params = [{transform_indices = @transform_0, window_bounds = array<i64: 8, 256>}, {pipeline_mode = #tpu.pipeline_mode<synchronous>, transform_indices = @transform_1, window_bounds = array<i64: 256, 128>}, {pipeline_mode = #tpu.pipeline_mode<synchronous>, transform_indices = @transform_2, window_bounds = array<i64: 1, 128>}, {transform_indices = @transform_3, window_bounds = array<i64: 8, 128>}]} {
    %c0 = arith.constant 0 : index
    %c0_0 = arith.constant 0 : index
    %0 = vector.load %arg1[%c0, %c0_0] : memref<8x256xf32, #tpu.memory_space<vmem>>, vector<8x256xf32>
    %c0_1 = arith.constant 0 : index
    %c0_2 = arith.constant 0 : index
    %1 = vector.load %arg2[%c0_1, %c0_2] : memref<256x128xf32, #tpu.memory_space<vmem>>, vector<256x128xf32>
    %cst = arith.constant dense<0.000000e+00> : vector<8x128xf32>
    %2 = tpu.matmul %0, %1, %cst {dimension_numbers = #tpu.dot_dimension_numbers<[1], [0], [0], [1], [0, 0, 1, 1], [], []>} : vector<8x256xf32>, vector<256x128xf32>, vector<8x128xf32> -> vector<8x128xf32>
    %c0_3 = arith.constant 0 : index
    %c0_4 = arith.constant 0 : index
    %3 = vector.load %arg3[%c0_3, %c0_4] : memref<1x128xf32, #tpu.memory_space<vmem>>, vector<1x128xf32>
    %4 = vector.broadcast %3 : vector<1x128xf32> to vector<8x128xf32>
    %5 = arith.addf %2, %4 : vector<8x128xf32>
    %cst_5 = arith.constant 2.000000e+00 : f32
    %6 = vector.broadcast %cst_5 : f32 to vector<8x128xf32>
    %7 = arith.mulf %6, %5 : vector<8x128xf32>
    %8 = arith.negf %7 : vector<8x128xf32>
    %9 = math.exp %8 : vector<8x128xf32>
    %cst_6 = arith.constant 1.000000e+00 : f32
    %10 = vector.broadcast %cst_6 : f32 to vector<8x128xf32>
    %11 = arith.addf %10, %9 : vector<8x128xf32>
    %12 = arith.divf %10, %11 : vector<8x128xf32>
    %c0_7 = arith.constant 0 : index
    %c0_8 = arith.constant 0 : index
    %13 = vector.load %arg4[%c0_7, %c0_8] : memref<8x128xf32, #tpu.memory_space<vmem>>, vector<8x128xf32>
    tpu.vector_store %arg4[%c0_7, %c0_8], %12 {strides = array<i32>} : memref<8x128xf32, #tpu.memory_space<vmem>>, vector<8x128xf32>,
    return
  }
  func.func @transform_0(%arg0: i32) -> (i32, i32) {
    %c0_i32 = arith.constant 0 : i32
    %c0_i32_0 = arith.constant 0 : i32
    return %arg0, %c0_i32 : i32, i32
  }
  func.func @transform_1(%arg0: i32) -> (i32, i32) {
    %c0_i32 = arith.constant 0 : i32
    %c0_i32_0 = arith.constant 0 : i32
    %c0_i32_1 = arith.constant 0 : i32
    return %c0_i32, %c0_i32_0 : i32, i32
  }
  func.func @transform_2(%arg0: i32) -> (i32, i32) {
    %c0_i32 = arith.constant 0 : i32
    %c0_i32_0 = arith.constant 0 : i32
    %c0_i32_1 = arith.constant 0 : i32
    return %c0_i32, %c0_i32_0 : i32, i32
  }
  func.func @transform_3(%arg0: i32) -> (i32, i32) {
    %c0_i32 = arith.constant 0 : i32
    %c0_i32_0 = arith.constant 0 : i32
    return %arg0, %c0_i32 : i32, i32
  }
}

</mosaic_0001>

<bundles_post_ra>
// kernel: tpu_custom_call.1
= control target key start
LH: loop header
LB: loop body
LE: loop exit
PB: predicated region body
PF: predicated region fallthrough
CT: control target
= control target key end

     0   :  { %8 = vsyncpa [#allocation3], 0  ;;  %s397_s0 = inlined_call_operand.hbm [shape: f32[8,256], index: 0, kind: input, shape index: {}]   ;;  %s398_s1 = inlined_call_operand.hbm [shape: f32[256,128], index: 1, kind: input, shape index: {}]   ;;  %s399_s2 = inlined_call_operand.vmem [shape: f32[1,128], index: 2, kind: input, shape index: {}]   ;;  %s400_s3 = inlined_call_operand.hbm [shape: f32[8,128], index: 3, kind: output, shape index: {}]  }
   0x1   :  { %9 = vsyncpa [#allocation6], 0 }
   0x2   :  { %10 = vsyncpa [#allocation4], 0  ;;  %s326_s12 = smov [#allocation2]   ;;  %s327_s14 = smov [#allocation5]  }
   0x3   :  { %s17_s13 = sshll.u32 %s326_s12, 4  ;;  %s26_s15 = sshll.u32 %s327_s14, 4  ;;  %s18_s13 = int_to_ptr.vmem [resolvable:$true] %s17_s13  ;;  %s351_s15 = int_to_ptr.vmem [resolvable:$true] %s26_s15 }
   0x4   :  { %s254_s18 = scalar_lea.hbm %s397_s0, 256 }
   0x5   :  { %p255_p0 = scmp.ne.s32.totalorder %s397_s0, %s254_s18  ;;  %p258_p1 = scmp.lt.u32.totalorder %s254_s18, %s397_s0 }
   0x7   :  { %p260_p2 = pnand %p258_p1, %p255_p0 }
   0x9   :  { %263 = shalt.err (!%p260_p2)
}
   0xa   :  { %s264_s23 = scalar_lea.vmem %s18_s13, 256  ;;  %p269_p4 = scmp.lt.s32.totalorder %s18_s13, %s18_s13 }
   0xb   :  { %p265_p3 = scmp.ne.s32.totalorder %s18_s13, %s264_s23  ;;  %p270_p5 = scmp.lt.s32.totalorder %s264_s23, %s264_s23 }
   0xd   :  { %p271_p6 = por %p270_p5, %p269_p4 }
   0xf   :  { %p272_p7 = pnand %p271_p6, %p265_p3 }
  0x11   :  { %275 = shalt.err (!%p272_p7)
}
  0x12   :  { %20 = dma.hbm_to_vmem [thread:$0]  %s397_s0, 256, %s18_s13, [#allocation3]  }
  0x13   :  { %s276_s28 = scalar_lea.hbm %s398_s1, 4096 }
  0x14   :  { %p277_p8 = scmp.ne.s32.totalorder %s398_s1, %s276_s28  ;;  %p280_p9 = scmp.lt.u32.totalorder %s276_s28, %s398_s1 }
  0x16   :  { %p282_p10 = pnand %p280_p9, %p277_p8 }
  0x18   :  { %285 = shalt.err (!%p282_p10)
}
  0x19   :  { %s286_s6 = scalar_lea.vmem %s351_s15, 4096  ;;  %p291_p12 = scmp.lt.s32.totalorder %s351_s15, %s351_s15 }
  0x1a   :  { %p287_p11 = scmp.ne.s32.totalorder %s351_s15, %s286_s6  ;;  %p292_p13 = scmp.lt.s32.totalorder %s286_s6, %s286_s6 }
  0x1c   :  { %p293_p0 = por %p292_p13, %p291_p12 }
  0x1e   :  { %p294_p1 = pnand %p293_p0, %p287_p11 }
  0x20   :  { %297 = shalt.err (!%p294_p1)
}
  0x21   :  { %s328_s0 = smov 128   ;;  %s329_s7 = smov 8  }
  0x22   :  { %32 = dma.hbm_to_vmem [thread:$0]  %s398_s1, 4096, %s351_s15, [#allocation6], %s328_s0, %s328_s0, %s329_s7  }
  0x23   :  { %320 = dma.done.wait [#allocation3], 256  }
  0x24   :  { %321 = vsyncadd [#allocation3], 4294967040 }
  0x25   :  { %322 = dma.done.wait [#allocation6], 4096  }
  0x26   :  { %323 = vsyncadd [#allocation6], 4294963200  ;;  %v59_v0 = vld [vmem:[#allocation5 + $0x80] sm:$0xff]  ;;  %v60_v1 = vld [vmem:[#allocation5 + $0x88] sm:$0xff]  ;;  %s330_s11 = smov [#allocation7]  }
  0x27   :  { %v43_v2 = vld [vmem:[#allocation5] sm:$0xff]  ;;  %v213_v3 = vpack.c.bf16 %v60_v1, %v59_v0  ;;  %v44_v4 = vld [vmem:[#allocation5 + $0x8] sm:$0xff]  ;;  %v61_v5 = vld [vmem:[#allocation5 + $0x90] sm:$0xff]  ;;  %s166_s12 = sshll.u32 %s330_s11, 4  ;;  %s167_s12 = int_to_ptr.vmem [resolvable:$true] %s166_s12 }
  0x28   :  { %v62_v6 = vld [vmem:[#allocation5 + $0x98] sm:$0xff]  ;;  %v215_v7 = vpack.c.bf16 %v44_v4, %v43_v2  ;;  %v45_v9 = vld [vmem:[#allocation5 + $0x10] sm:$0xff]  ;;  %v63_v11 = vld [vmem:[#allocation5 + $0xa0] sm:$0xff]  ;;  %s298_s13 = scalar_lea.vmem %s167_s12, 128  ;;  %p303_p3 = scmp.lt.s32.totalorder %s167_s12, %s167_s12 }
  0x29   :  { %v217_v8 = vpack.c.bf16 %v62_v6, %v61_v5  ;;  %v46_v10 = vld [vmem:[#allocation5 + $0x18] sm:$0xff]  ;;  %214 = vmatprep.subr.bf16.mxu0 %v213_v3  ;;  %v64_v12 = vld [vmem:[#allocation5 + $0xa8] sm:$0xff]  ;;  %v47_v15 = vld [vmem:[#allocation5 + $0x20] sm:$0xff]  ;;  %p299_p2 = scmp.ne.s32.totalorder %s167_s12, %s298_s13  ;;  %p304_p4 = scmp.lt.s32.totalorder %s298_s13, %s298_s13 }
  0x2a   :  { %216 = vmatpush3.bf16.msra.mxu0 %v215_v7  ;;  %v219_v13 = vpack.c.bf16 %v46_v10, %v45_v9  ;;  %v221_v14 = vpack.c.bf16 %v64_v12, %v63_v11  ;;  %v48_v16 = vld [vmem:[#allocation5 + $0x28] sm:$0xff]  ;;  %v65_v17 = vld [vmem:[#allocation5 + $0xb0] sm:$0xff]  ;;  %v66_v18 = vld [vmem:[#allocation5 + $0xb8] sm:$0xff] }
  0x2b   :  { %218 = vmatprep.subr.bf16.mxu0 %v217_v8  ;;  %v223_v19 = vpack.c.bf16 %v48_v16, %v47_v15  ;;  %v225_v20 = vpack.c.bf16 %v66_v18, %v65_v17  ;;  %v49_v21 = vld [vmem:[#allocation5 + $0x30] sm:$0xff]  ;;  %v50_v22 = vld [vmem:[#allocation5 + $0x38] sm:$0xff]  ;;  %v67_v23 = vld [vmem:[#allocation5 + $0xc0] sm:$0xff]  ;;  %p305_p5 = por %p304_p4, %p303_p3 }
  0x2c   :  { %v68_v24 = vld [vmem:[#allocation5 + $0xc8] sm:$0xff]  ;;  %v42_v25 = vld [vmem:[#allocation2 + $0x8] sm:$0xff]  ;;  %v227_v26 = vpack.c.bf16 %v50_v22, %v49_v21  ;;  %v51_v28 = vld [vmem:[#allocation5 + $0x40] sm:$0xff] }
  0x2d   :  { %146 = vmatprep.mubr.f32.mxu0 %v42_v25  ;;  %v229_v27 = vpack.c.bf16 %v68_v24, %v67_v23  ;;  %v52_v29 = vld [vmem:[#allocation5 + $0x48] sm:$0xff]  ;;  %v69_v30 = vld [vmem:[#allocation5 + $0xd0] sm:$0xff]  ;;  %v70_v31 = vld [vmem:[#allocation5 + $0xd8] sm:$0xff]  ;;  %p306_p6 = pnand %p305_p5, %p299_p2 }
  0x2e   :  { %220 = vmatpush3.bf16.msra.mxu0 %v219_v13  ;;  %v231_v32 = vpack.c.bf16 %v52_v29, %v51_v28  ;;  %v233_v33 = vpack.c.bf16 %v70_v31, %v69_v30  ;;  %v53_v34 = vld [vmem:[#allocation5 + $0x50] sm:$0xff]  ;;  %v54_v35 = vld [vmem:[#allocation5 + $0x58] sm:$0xff]  ;;  %v71_v36 = vld [vmem:[#allocation5 + $0xe0] sm:$0xff] }
  0x2f   :  { %222 = vmatprep.subr.bf16.mxu0 %v221_v14  ;;  %v72_v37 = vld [vmem:[#allocation5 + $0xe8] sm:$0xff]  ;;  %v235_v38 = vpack.c.bf16 %v54_v35, %v53_v34  ;;  %v55_v40 = vld [vmem:[#allocation5 + $0x60] sm:$0xff]  ;;  %v73_v42 = vld [vmem:[#allocation5 + $0xf0] sm:$0xff] }
  0x30   :  { %v237_v39 = vpack.c.bf16 %v72_v37, %v71_v36  ;;  %v56_v41 = vld [vmem:[#allocation5 + $0x68] sm:$0xff]  ;;  %v74_v43 = vld [vmem:[#allocation5 + $0xf8] sm:$0xff]  ;;  %v57_v46 = vld [vmem:[#allocation5 + $0x70] sm:$0xff] }
  0x31   :  { %v239_v44 = vpack.c.bf16 %v56_v41, %v55_v40  ;;  %v241_v45 = vpack.c.bf16 %v74_v43, %v73_v42  ;;  %v58_v47 = vld [vmem:[#allocation5 + $0x78] sm:$0xff]  ;;  %v41_v49 = vld [vmem:[#allocation2] sm:$0xff] }
  0x32   :  { %224 = vmatpush3.bf16.msra.mxu0 %v223_v19  ;;  %v243_v48 = vpack.c.bf16 %v58_v47, %v57_v46  ;;  %v176_v51 = vld [vmem:[%s399_s2] ss:$0 sm:$0xff] }
  0x33   :  { %226 = vmatprep.subr.bf16.mxu0 %v225_v20 }
  0x36   :  { %228 = vmatpush3.bf16.msra.mxu0 %v227_v26 }
  0x37   :  { %230 = vmatprep.subr.bf16.mxu0 %v229_v27 }
  0x3a   :  { %232 = vmatpush3.bf16.msra.mxu0 %v231_v32 }
  0x3b   :  { %234 = vmatprep.subr.bf16.mxu0 %v233_v33 }
  0x3e   :  { %236 = vmatpush3.bf16.msra.mxu0 %v235_v38 }
  0x3f   :  { %238 = vmatprep.subr.bf16.mxu0 %v237_v39 }
  0x42   :  { %240 = vmatpush3.bf16.msra.mxu0 %v239_v44 }
  0x43   :  { %242 = vmatprep.subr.bf16.mxu0 %v241_v45 }
  0x46   :  { %244 = vmatpush3.bf16.msra.mxu0 %v243_v48 }
  0x49   :  { %147 = vmatmul.mubr.f32.vlgmr.msra.gmra.mrb[0].mxu0 %v41_v49 }
 0x11c   :  { %v210_v50 = vpop.f32.mrb[0].mxu0 }
 0x11d   :  { %v211_v52 = vpop.f32.mrb[1].mxu0 }
 0x11e   :  { %v212_v53 = vadd.f32 %v211_v52, %v210_v50 }
 0x120   :  { %v149_v54 = vadd.f32 %v212_v53, %v176_v51 }
 0x122   :  { %v177_v55 = vmul.f32 -2.0, %v149_v54 }
 0x124   :  { %v154_v56 = vmul.f32 1.442695, %v177_v55 }
 0x126   :  { %250 = vpow2.f32 %v154_v56 }
 0x130   :  { %v251_v57 = vpop.eup %250 }
 0x131   :  { %v156_v58 = vadd.f32 1.0, %v251_v57 }
 0x133   :  { %252 = vrcp.f32 %v156_v58 }
 0x13d   :  { %v253_v59 = vpop.eup %252 }
 0x13e   :  { %159 = vst [vmem:[#allocation7] sm:$0xff] %v253_v59 }
 0x13f   :  { %309 = shalt.err (!%p306_p6)
}
 0x140   :  { %s310_s15 = scalar_lea.hbm %s400_s3, 128 }
 0x141   :  { %p311_p7 = scmp.ne.s32.totalorder %s400_s3, %s310_s15  ;;  %p314_p8 = scmp.lt.u32.totalorder %s310_s15, %s400_s3 }
 0x143   :  { %p316_p9 = pnand %p314_p8, %p311_p7 }
 0x145   :  { %319 = shalt.err (!%p316_p9)
}
 0x146   :  { %169 = dma.vmem_to_hbm [thread:$0]  %s167_s12, 128, %s400_s3, [#allocation4]  }
 0x147   :  { %324 = dma.done.wait [#allocation4], 128  }
 0x148   :  { %325 = vsyncadd [#allocation4], 4294967168 }
 0x149   :  { %173 = vsyncpa [#allocation3], 1 }
 0x14a   :  { %174 = vsyncpa [#allocation6], 1 }
 0x14b   :  { %175 = vsyncpa [#allocation4], 1 }

</bundles_post_ra>
